<compile_context>
chip_gen: v6e
topology: v6e:2x2x1
jax: 0.10.0
libtpu: 0.0.40
codegen_flags: <defaults>
</compile_context>

<pallas_src>
from functools import partial

import jax
import jax.numpy as jnp
from jax.experimental import pallas as pl
from jax.experimental.pallas import tpu as pltpu


# ---------------------------------------------------------------------------
# Kernel
# ---------------------------------------------------------------------------
def disease_head_kernel(x_ref, w1_ref, b1_ref, w2_ref, b2_ref, wh_ref, bh_ref, out_ref):
    # x arrives as raw f32; cast on the VPU (free under the MXU).
    x = x_ref[...].astype(jnp.bfloat16)                                        # [TB, h]
    # encoder.ffn : Linear(hidden, hidden) -> ReLU -> Linear(hidden, latent)
    h = jnp.dot(x, w1_ref[...], preferred_element_type=jnp.float32) + b1_ref[...]
    h = jnp.maximum(h, 0.0).astype(jnp.bfloat16)                               # [TB, Hp]
    z = jnp.dot(h, w2_ref[...], preferred_element_type=jnp.float32) + b2_ref[...]
    # DTI_forward: sigmoid (EUP). Padded latent lanes give sigmoid(0)=0.5 but the
    # corresponding fused-head weight rows are zero, so they contribute nothing.
    dti = jax.nn.sigmoid(z).astype(jnp.bfloat16)                               # [TB, Lp]
    # Fused task heads: col 0 = tgt_ffn, cols 1..1+num_tasks = src_ffn, rest zero pad.
    out = jnp.dot(dti, wh_ref[...], preferred_element_type=jnp.float32) + bh_ref[...]
    out_ref[...] = out.astype(out_ref.dtype)                                   # bf16 writeback


# ---------------------------------------------------------------------------
# Helpers
# ---------------------------------------------------------------------------
def _round_up(v, m):
    return (v + m - 1) // m * m


def _ceil_div(a, b):
    return -(-a // b)


def _choose_batch_tiling(B, tile_b):
    """Pick (TB, Bp, steps): minimise batch padding; prefer an even step count
    (v7x has 2 TensorCores) when the extra padding is negligible."""
    def plan(n):
        tb = _round_up(_ceil_div(B, n), 8)
        return tb, tb * n, n

    tb, bp, n = plan(max(1, _ceil_div(B, tile_b)))
    if n % 2 == 1:
        tb2, bp2, n2 = plan(n + 1)
        if bp2 - bp <= B // 8:      # split across both TCs only when near-free
            tb, bp, n = tb2, bp2, n2
    return tb, bp, n


def _pad_dim(d, prefer_256=True):
    """Lane padding: 128 by default; bump to a 256 multiple when d is within ~20%
    of one (feeds the 256-wide v6e/v7x MXU; 128 stays optimal for v5e / tiny dims)."""
    p128 = _round_up(d, 128)
    p256 = _round_up(d, 256)
    if prefer_256 and p256 <= int(1.2 * d):
        return p256
    return p128


# ---------------------------------------------------------------------------
# Wrapper
# ---------------------------------------------------------------------------
def _fused_forward(x, w1, b1, w2, b2, wh, bh, tile_b):
    """x: [B, hidden] f32 MPN features (un-padded). Returns bf16 [B, Op] slab."""
    B, h = x.shape
    Hp, Lp, Op = w1.shape[1], w2.shape[1], wh.shape[1]

    TB, Bp, steps = _choose_batch_tiling(B, tile_b)
    if Bp != B:
        # Minimal batch pad only (few rows); no feature padding, no dtype change.
        x = jnp.pad(x, ((0, Bp - B), (0, 0)))

    # VMEM budget: double-buffered x/out tiles + resident (pipeline double-buffered)
    # weights + in-kernel intermediates (bf16 x copy, f32+bf16 h, f32 z, bf16 dti,
    # f32 out). 2x margin, no 32 MiB floor, capped below v7x's 64 MiB core.
    bytes_tiles = 2 * TB * h * 4 + 2 * TB * Op * 2
    bytes_weight = 2 * ((h * Hp + Hp * Lp + Lp * Op) * 2 + (Hp + Lp + Op) * 4)
    bytes_interm = TB * (2 * h + 6 * Hp + 6 * Lp + 4 * Op)
    needed = bytes_tiles + bytes_weight + bytes_interm
    vmem_limit = int(min(max(2 * needed, 4 << 20), 48 << 20))

    cost = pl.CostEstimate(
        flops=2 * Bp * (h * Hp + Hp * Lp + Lp * Op),
        transcendentals=Bp * Lp,
        bytes_accessed=(Bp * h * 4                                  # x (f32, read once)
                        + (h * Hp + Hp * Lp + Lp * Op) * 2          # weights (bf16)
                        + (Hp + Lp + Op) * 4                        # biases (f32)
                        + Bp * Op * 2),                             # out (bf16)
    )

    out_pad = pl.pallas_call(
        disease_head_kernel,
        out_shape=jax.ShapeDtypeStruct((Bp, Op), jnp.bfloat16),
        grid=(steps,),
        in_specs=[
            pl.BlockSpec((TB, h), lambda i: (i, 0)),     # x: streamed per batch tile
            pl.BlockSpec((h, Hp), lambda i: (0, 0)),     # weights/biases: VMEM-resident
            pl.BlockSpec((1, Hp), lambda i: (0, 0)),
            pl.BlockSpec((Hp, Lp), lambda i: (0, 0)),
            pl.BlockSpec((1, Lp), lambda i: (0, 0)),
            pl.BlockSpec((Lp, Op), lambda i: (0, 0)),
            pl.BlockSpec((1, Op), lambda i: (0, 0)),
        ],
        out_specs=pl.BlockSpec((TB, Op), lambda i: (i, 0)),
        compiler_params=pltpu.CompilerParams(
            dimension_semantics=("parallel",),
            vmem_limit_bytes=vmem_limit,
        ),
        cost_estimate=cost,
    )(x, w1, b1, w2, b2, wh, bh)

    return out_pad[:B]


@partial(jax.jit, static_argnames=("num_tasks", "tile_b"))
def _forward_both_jit(x, w1, b1, w2, b2, wh, bh, *, num_tasks, tile_b):
    out = _fused_forward(x, w1, b1, w2, b2, wh, bh, tile_b)
    tgt = out[:, 0:1].astype(jnp.float32)
    src = out[:, 1:1 + num_tasks].astype(jnp.float32)
    return tgt, src


def disease_model_forward_both(x, padded_params, tile_b=1024):
    """One kernel launch, x streamed once; returns (tgt_out [B,1], src_out [B,num_tasks])."""
    pp = padded_params
    return _forward_both_jit(x, pp["w1"], pp["b1"], pp["w2"], pp["b2"], pp["wh"], pp["bh"],
                             num_tasks=pp["num_tasks"], tile_b=tile_b)


def disease_model_forward(x, padded_params, mode, tile_b=1024):
    """mode: 0 -> tgt_ffn (out=1), 1 -> src_ffn (out=num_tasks). Matches PyTorch self.ffn[mode]."""
    tgt, src = disease_model_forward_both(x, padded_params, tile_b)
    return tgt if mode == 0 else src


# ---------------------------------------------------------------------------
# Parameters
# ---------------------------------------------------------------------------
def xavier_normal(key, fan_in, fan_out, dtype=jnp.float32):
    # nn.init.xavier_normal_: std = sqrt(2 / (fan_in + fan_out)), gain = 1
    std = (2.0 / (fan_in + fan_out)) ** 0.5
    return std * jax.random.normal(key, (fan_in, fan_out), dtype=dtype)


def init_params(key, hidden_size, latent_size, num_tasks):
    k1, k2, k3, k4 = jax.random.split(key, 4)
    # biases (dim == 1 params) -> constant 0, matrices -> xavier_normal
    return {
        "w1": xavier_normal(k1, hidden_size, hidden_size),
        "b1": jnp.zeros((1, hidden_size), jnp.float32),
        "w2": xavier_normal(k2, hidden_size, latent_size),
        "b2": jnp.zeros((1, latent_size), jnp.float32),
        "w_src": xavier_normal(k3, latent_size, num_tasks),
        "b_src": jnp.zeros((1, num_tasks), jnp.float32),
        "w_tgt": xavier_normal(k4, latent_size, 1),
        "b_tgt": jnp.zeros((1, 1), jnp.float32),
    }


def pad_params(params, num_tasks, prefer_256=True):
    """Zero-pad output feature dims, cast matrices to bf16, fuse both task heads.
    W1 keeps its true `hidden` row count so the raw (un-padded) f32 x feeds it directly."""
    h = params["w1"].shape[0]
    l = params["w2"].shape[1]
    Hp = _pad_dim(h, prefer_256)
    Lp = _pad_dim(l, prefer_256)
    Op = _pad_dim(1 + num_tasks, prefer_256)

    w1 = jnp.zeros((h, Hp), jnp.bfloat16).at[:, :h].set(params["w1"].astype(jnp.bfloat16))
    b1 = jnp.zeros((1, Hp), jnp.float32).at[:, :h].set(params["b1"])
    w2 = jnp.zeros((Hp, Lp), jnp.bfloat16).at[:h, :l].set(params["w2"].astype(jnp.bfloat16))
    b2 = jnp.zeros((1, Lp), jnp.float32).at[:, :l].set(params["b2"])

    wh = jnp.zeros((Lp, Op), jnp.bfloat16)
    wh = wh.at[:l, 0:1].set(params["w_tgt"].astype(jnp.bfloat16))
    wh = wh.at[:l, 1:1 + num_tasks].set(params["w_src"].astype(jnp.bfloat16))
    bh = jnp.zeros((1, Op), jnp.float32)
    bh = bh.at[:, 0:1].set(params["b_tgt"])
    bh = bh.at[:, 1:1 + num_tasks].set(params["b_src"])

    return {"w1": w1, "b1": b1, "w2": w2, "b2": b2, "wh": wh, "bh": bh,
            "hidden": h, "latent": l, "num_tasks": num_tasks}


# ---------------------------------------------------------------------------
# Reference (pure f32 JAX mirror of the PyTorch module)
# ---------------------------------------------------------------------------
def reference_forward(x, params, mode):
    h = jnp.maximum(x @ params["w1"] + params["b1"], 0.0)
    dti = jax.nn.sigmoid(h @ params["w2"] + params["b2"])
    if mode == 0:
        return dti @ params["w_tgt"] + params["b_tgt"]
    return dti @ params["w_src"] + params["b_src"]


if __name__ == "__main__":
    B, hidden_size, latent_size, num_tasks = 8, 32, 16, 8

    key = jax.random.PRNGKey(0)
    kx, kp = jax.random.split(key)
    x = jax.random.normal(kx, (B, hidden_size), jnp.float32)
    params = init_params(kp, hidden_size, latent_size, num_tasks)
    padded = pad_params(params, num_tasks)

    # Fused call: both heads from a single kernel launch (x streamed from HBM once).
    out_tgt, out_src = disease_model_forward_both(x, padded)
    out_tgt = jax.block_until_ready(out_tgt)
    out_src = jax.block_until_ready(out_src)

    # Single-mode API matching the PyTorch forward(smiles_batch, mode).
    out_mode0 = jax.block_until_ready(disease_model_forward(x, padded, mode=0))
    out_mode1 = jax.block_until_ready(disease_model_forward(x, padded, mode=1))

    ref_tgt = reference_forward(x, params, mode=0)
    ref_src = reference_forward(x, params, mode=1)

    assert out_tgt.shape == (B, 1)
    assert out_src.shape == (B, num_tasks)
    # bf16 weights/activations/output with f32 accumulation vs f32 reference.
    assert jnp.allclose(out_tgt, ref_tgt, atol=3e-2, rtol=3e-2)
    assert jnp.allclose(out_src, ref_src, atol=3e-2, rtol=3e-2)
    assert jnp.allclose(out_mode0, out_tgt) and jnp.allclose(out_mode1, out_src)

    print("KERNEL_OK")
</pallas_src>

<mosaic_0001>
module attributes {stable_mosaic.version = 11 : i64} {
  func.func @disease_head_kernel(%arg0: i32, %arg1: memref<8x32xf32, #tpu.memory_space<vmem>>, %arg2: memref<32x128xbf16, #tpu.memory_space<vmem>>, %arg3: memref<1x128xf32, #tpu.memory_space<vmem>>, %arg4: memref<128x128xbf16, #tpu.memory_space<vmem>>, %arg5: memref<1x128xf32, #tpu.memory_space<vmem>>, %arg6: memref<128x128xbf16, #tpu.memory_space<vmem>>, %arg7: memref<1x128xf32, #tpu.memory_space<vmem>>, %arg8: memref<8x128xbf16, #tpu.memory_space<vmem>>) attributes {dimension_semantics = [#tpu.dimension_semantics<parallel>], iteration_bounds = array<i64: 1>, scalar_prefetch = 0 : i64, scratch_operands = 0 : i64, tpu.core_type = #tpu.core_type<tc>, window_params = [{transform_indices = @transform_0, window_bounds = array<i64: 8, 32>}, {pipeline_mode = #tpu.pipeline_mode<synchronous>, transform_indices = @transform_1, window_bounds = array<i64: 32, 128>}, {pipeline_mode = #tpu.pipeline_mode<synchronous>, transform_indices = @transform_2, window_bounds = array<i64: 1, 128>}, {pipeline_mode = #tpu.pipeline_mode<synchronous>, transform_indices = @transform_3, window_bounds = array<i64: 128, 128>}, {pipeline_mode = #tpu.pipeline_mode<synchronous>, transform_indices = @transform_4, window_bounds = array<i64: 1, 128>}, {pipeline_mode = #tpu.pipeline_mode<synchronous>, transform_indices = @transform_5, window_bounds = array<i64: 128, 128>}, {pipeline_mode = #tpu.pipeline_mode<synchronous>, transform_indices = @transform_6, window_bounds = array<i64: 1, 128>}, {transform_indices = @transform_7, window_bounds = array<i64: 8, 128>}]} {
    %c0 = arith.constant 0 : index
    %c0_0 = arith.constant 0 : index
    %0 = vector.load %arg1[%c0, %c0_0] : memref<8x32xf32, #tpu.memory_space<vmem>>, vector<8x32xf32>
    %1 = arith.truncf %0 : vector<8x32xf32> to vector<8x32xbf16>
    %c0_1 = arith.constant 0 : index
    %c0_2 = arith.constant 0 : index
    %2 = vector.load %arg2[%c0_1, %c0_2] : memref<32x128xbf16, #tpu.memory_space<vmem>>, vector<32x128xbf16>
    %cst = arith.constant dense<0.000000e+00> : vector<8x128xf32>
    %3 = tpu.matmul %1, %2, %cst {dimension_numbers = #tpu.dot_dimension_numbers<[1], [0], [0], [1], [0, 0, 1, 1], [], []>} : vector<8x32xbf16>, vector<32x128xbf16>, vector<8x128xf32> -> vector<8x128xf32>
    %c0_3 = arith.constant 0 : index
    %c0_4 = arith.constant 0 : index
    %4 = vector.load %arg3[%c0_3, %c0_4] : memref<1x128xf32, #tpu.memory_space<vmem>>, vector<1x128xf32>
    %5 = vector.broadcast %4 : vector<1x128xf32> to vector<8x128xf32>
    %6 = arith.addf %3, %5 : vector<8x128xf32>
    %cst_5 = arith.constant 0.000000e+00 : f32
    %7 = vector.broadcast %cst_5 : f32 to vector<8x128xf32>
    %8 = arith.maximumf %6, %7 : vector<8x128xf32>
    %9 = arith.truncf %8 : vector<8x128xf32> to vector<8x128xbf16>
    %c0_6 = arith.constant 0 : index
    %c0_7 = arith.constant 0 : index
    %10 = vector.load %arg4[%c0_6, %c0_7] : memref<128x128xbf16, #tpu.memory_space<vmem>>, vector<128x128xbf16>
    %cst_8 = arith.constant dense<0.000000e+00> : vector<8x128xf32>
    %11 = tpu.matmul %9, %10, %cst_8 {dimension_numbers = #tpu.dot_dimension_numbers<[1], [0], [0], [1], [0, 0, 1, 1], [], []>} : vector<8x128xbf16>, vector<128x128xbf16>, vector<8x128xf32> -> vector<8x128xf32>
    %c0_9 = arith.constant 0 : index
    %c0_10 = arith.constant 0 : index
    %12 = vector.load %arg5[%c0_9, %c0_10] : memref<1x128xf32, #tpu.memory_space<vmem>>, vector<1x128xf32>
    %13 = vector.broadcast %12 : vector<1x128xf32> to vector<8x128xf32>
    %14 = arith.addf %11, %13 : vector<8x128xf32>
    %15 = arith.negf %14 : vector<8x128xf32>
    %16 = math.exp %15 : vector<8x128xf32>
    %cst_11 = arith.constant 1.000000e+00 : f32
    %17 = vector.broadcast %cst_11 : f32 to vector<8x128xf32>
    %18 = arith.addf %17, %16 : vector<8x128xf32>
    %19 = arith.divf %17, %18 : vector<8x128xf32>
    %20 = arith.truncf %19 : vector<8x128xf32> to vector<8x128xbf16>
    %c0_12 = arith.constant 0 : index
    %c0_13 = arith.constant 0 : index
    %21 = vector.load %arg6[%c0_12, %c0_13] : memref<128x128xbf16, #tpu.memory_space<vmem>>, vector<128x128xbf16>
    %cst_14 = arith.constant dense<0.000000e+00> : vector<8x128xf32>
    %22 = tpu.matmul %20, %21, %cst_14 {dimension_numbers = #tpu.dot_dimension_numbers<[1], [0], [0], [1], [0, 0, 1, 1], [], []>} : vector<8x128xbf16>, vector<128x128xbf16>, vector<8x128xf32> -> vector<8x128xf32>
    %c0_15 = arith.constant 0 : index
    %c0_16 = arith.constant 0 : index
    %23 = vector.load %arg7[%c0_15, %c0_16] : memref<1x128xf32, #tpu.memory_space<vmem>>, vector<1x128xf32>
    %24 = vector.broadcast %23 : vector<1x128xf32> to vector<8x128xf32>
    %25 = arith.addf %22, %24 : vector<8x128xf32>
    %26 = arith.truncf %25 : vector<8x128xf32> to vector<8x128xbf16>
    %c0_17 = arith.constant 0 : index
    %c0_18 = arith.constant 0 : index
    %27 = vector.load %arg8[%c0_17, %c0_18] : memref<8x128xbf16, #tpu.memory_space<vmem>>, vector<8x128xbf16>
    tpu.vector_store %arg8[%c0_17, %c0_18], %26 {strides = array<i32>} : memref<8x128xbf16, #tpu.memory_space<vmem>>, vector<8x128xbf16>,
    return
  }
  func.func @transform_0(%arg0: i32) -> (i32, i32) {
    %c0_i32 = arith.constant 0 : i32
    %c0_i32_0 = arith.constant 0 : i32
    return %arg0, %c0_i32 : i32, i32
  }
  func.func @transform_1(%arg0: i32) -> (i32, i32) {
    %c0_i32 = arith.constant 0 : i32
    %c0_i32_0 = arith.constant 0 : i32
    %c0_i32_1 = arith.constant 0 : i32
    return %c0_i32, %c0_i32_0 : i32, i32
  }
  func.func @transform_2(%arg0: i32) -> (i32, i32) {
    %c0_i32 = arith.constant 0 : i32
    %c0_i32_0 = arith.constant 0 : i32
    %c0_i32_1 = arith.constant 0 : i32
    return %c0_i32, %c0_i32_0 : i32, i32
  }
  func.func @transform_3(%arg0: i32) -> (i32, i32) {
    %c0_i32 = arith.constant 0 : i32
    %c0_i32_0 = arith.constant 0 : i32
    %c0_i32_1 = arith.constant 0 : i32
    return %c0_i32, %c0_i32_0 : i32, i32
  }
  func.func @transform_4(%arg0: i32) -> (i32, i32) {
    %c0_i32 = arith.constant 0 : i32
    %c0_i32_0 = arith.constant 0 : i32
    %c0_i32_1 = arith.constant 0 : i32
    return %c0_i32, %c0_i32_0 : i32, i32
  }
  func.func @transform_5(%arg0: i32) -> (i32, i32) {
    %c0_i32 = arith.constant 0 : i32
    %c0_i32_0 = arith.constant 0 : i32
    %c0_i32_1 = arith.constant 0 : i32
    return %c0_i32, %c0_i32_0 : i32, i32
  }
  func.func @transform_6(%arg0: i32) -> (i32, i32) {
    %c0_i32 = arith.constant 0 : i32
    %c0_i32_0 = arith.constant 0 : i32
    %c0_i32_1 = arith.constant 0 : i32
    return %c0_i32, %c0_i32_0 : i32, i32
  }
  func.func @transform_7(%arg0: i32) -> (i32, i32) {
    %c0_i32 = arith.constant 0 : i32
    %c0_i32_0 = arith.constant 0 : i32
    return %arg0, %c0_i32 : i32, i32
  }
}

</mosaic_0001>

<bundles_post_ra>
// kernel: _forward_both_jit.1
= control target key start
LH: loop header
LB: loop body
LE: loop exit
PB: predicated region body
PF: predicated region fallthrough
CT: control target
= control target key end

     0   :  { %12 = vsyncpa [#allocation3], 0  ;;  %s702_s0 = inlined_call_operand.hbm [shape: f32[8,32], index: 0, kind: input, shape index: {}]   ;;  %s703_s1 = inlined_call_operand.hbm [shape: bf16[32,128], index: 1, kind: input, shape index: {}]   ;;  %s704_s2 = inlined_call_operand.vmem [shape: f32[1,128], index: 2, kind: input, shape index: {}]   ;;  %s705_s3 = inlined_call_operand.hbm [shape: bf16[128,128], index: 3, kind: input, shape index: {}]   ;;  %s706_s4 = inlined_call_operand.vmem [shape: f32[1,128], index: 4, kind: input, shape index: {}]   ;;  %s707_s5 = inlined_call_operand.hbm [shape: bf16[128,128], index: 5, kind: input, shape index: {}]   ;;  %s708_s6 = inlined_call_operand.vmem [shape: f32[1,128], index: 6, kind: input, shape index: {}]   ;;  %s709_s7 = inlined_call_operand.vmem [shape: bf16[8,128], index: 7, kind: output, shape index: {}]  }
   0x1   :  { %13 = vsyncpa [#allocation5], 0 }
   0x2   :  { %14 = vsyncpa [#allocation8], 0  ;;  %s597_s24 = smov [#allocation4]  }
   0x3   :  { %s30_s25 = sshll.u32 %s597_s24, 4  ;;  %s31_s25 = int_to_ptr.vmem [resolvable:$true] %s30_s25 }
   0x4   :  { %s519_s26 = scalar_lea.vmem %s31_s25, 256  ;;  %p524_p1 = scmp.lt.s32.totalorder %s31_s25, %s31_s25 }
   0x5   :  { %p520_p0 = scmp.ne.s32.totalorder %s31_s25, %s519_s26  ;;  %p525_p2 = scmp.lt.s32.totalorder %s519_s26, %s519_s26 }
   0x7   :  { %p526_p3 = por %p525_p2, %p524_p1 }
   0x9   :  { %p527_p4 = pnand %p526_p3, %p520_p0 }
   0xb   :  { %530 = shalt.err (!%p527_p4)
}
   0xc   :  { %s598_s27 = smov 64   ;;  %s599_s28 = smov 4  }
   0xd   :  { %36 = dma.hbm_to_vmem [thread:$0]  %s703_s1, 256, %s31_s25, [#allocation5], %s598_s27, %s598_s27, %s599_s28  }
   0xe   :  { %s600_s8 = smov [#allocation2]   ;;  %s601_s10 = smov [#allocation6]  }
   0xf   :  { %s21_s9 = sshll.u32 %s600_s8, 4  ;;  %s44_s11 = sshll.u32 %s601_s10, 4  ;;  %s22_s9 = int_to_ptr.vmem [resolvable:$true] %s21_s9  ;;  %s45_s11 = int_to_ptr.vmem [resolvable:$true] %s44_s11 }
  0x10   :  { %s539_s12 = scalar_lea.vmem %s22_s9, 128  ;;  %p544_p6 = scmp.lt.s32.totalorder %s22_s9, %s22_s9 }
  0x11   :  { %p540_p5 = scmp.ne.s32.totalorder %s22_s9, %s539_s12  ;;  %p545_p7 = scmp.lt.s32.totalorder %s539_s12, %s539_s12 }
  0x13   :  { %p546_p8 = por %p545_p7, %p544_p6 }
  0x15   :  { %p547_p9 = pnand %p546_p8, %p540_p5 }
  0x17   :  { %550 = shalt.err (!%p547_p9)
}
  0x18   :  { %24 = dma.hbm_to_vmem [thread:$0]  %s702_s0, 128, %s22_s9, [#allocation3]  }
  0x19   :  { %s559_s15 = scalar_lea.vmem %s45_s11, 1024  ;;  %p564_p11 = scmp.lt.s32.totalorder %s45_s11, %s45_s11 }
  0x1a   :  { %p560_p10 = scmp.ne.s32.totalorder %s45_s11, %s559_s15  ;;  %p565_p12 = scmp.lt.s32.totalorder %s559_s15, %s559_s15 }
  0x1c   :  { %p566_p13 = por %p565_p12, %p564_p11 }
  0x1e   :  { %p567_p0 = pnand %p566_p13, %p560_p10 }
  0x20   :  { %570 = shalt.err (!%p567_p0)
}
  0x21   :  { %50 = dma.hbm_to_vmem [thread:$0]  %s705_s3, 1024, %s45_s11, [#allocation5], %s598_s27, %s598_s27, %s599_s28  }
  0x22   :  { %s602_s17 = smov [#allocation7]  }
  0x23   :  { %s58_s18 = sshll.u32 %s602_s17, 4  ;;  %s59_s18 = int_to_ptr.vmem [resolvable:$true] %s58_s18 }
  0x24   :  { %s579_s19 = scalar_lea.vmem %s59_s18, 1024  ;;  %p584_p2 = scmp.lt.s32.totalorder %s59_s18, %s59_s18 }
  0x25   :  { %p580_p1 = scmp.ne.s32.totalorder %s59_s18, %s579_s19  ;;  %p585_p3 = scmp.lt.s32.totalorder %s579_s19, %s579_s19 }
  0x27   :  { %p586_p4 = por %p585_p3, %p584_p2 }
  0x29   :  { %p587_p5 = pnand %p586_p4, %p580_p1 }
  0x2b   :  { %590 = shalt.err (!%p587_p5)
}
  0x2c   :  { %64 = dma.hbm_to_vmem [thread:$0]  %s707_s5, 1024, %s59_s18, [#allocation8], %s598_s27, %s598_s27, %s599_s28  }
  0x2d   :  { %591 = dma.done.wait [#allocation3], 128  }
  0x2e   :  { %592 = vsyncadd [#allocation3], 4294967168 }
  0x2f   :  { %593 = dma.done.wait [#allocation5], 1280  }
  0x30   :  { %594 = vsyncadd [#allocation5], 4294966016 }
  0x31   :  { %595 = dma.done.wait [#allocation8], 1024  }
  0x32   :  { %596 = vsyncadd [#allocation8], 4294966272  ;;  %v603_v0 = vmov 0.0   ;;  %vm604_vm0 = vmmov 0   ;;  %v489_v1 = vld [vmem:[#allocation4 + $0x8] sm:$0xff]   ;;  %v490_v2 = vld [vmem:[#allocation4] sm:$0xff]  }
  0x33   :  { %433 = vmatprep.subr.bf16.mxu0 %v603_v0  ;;  %437 = vmatprep.mubr.msk.bf16.mxu0 %vm604_vm0, %v603_v0  ;;  %v80_v3 = vld [vmem:[#allocation2] sm:$0xff]  ;;  %v491_v4 = vld [vmem:[#allocation6 + $0x38] sm:$0xff]   ;;  %v492_v6 = vld [vmem:[#allocation6 + $0x30] sm:$0xff]   ;;  %vm105_vm1 = vcmask 261120  }
  0x34   :  { %441 = vmatprep.subr.bf16.mxu1 %v603_v0  ;;  %457 = vmatprep.mubr.msk.bf16.mxu1 %vm604_vm0, %v603_v0  ;;  %v81_v5 = vpack.c.bf16 %v80_v3, %v80_v3  ;;  %v493_v7 = vld [vmem:[#allocation6 + $0x28] sm:$0xff]   ;;  %v494_v8 = vld [vmem:[#allocation6 + $0x20] sm:$0xff]   ;;  %v495_v9 = vld [vmem:[#allocation6 + $0x18] sm:$0xff]  }
  0x35   :  { %434 = vmatpush3.bf16.msra.mxu0 %v489_v1  ;;  %442 = vmatpush3.bf16.msra.mxu1 %v491_v4  ;;  %v496_v10 = vld [vmem:[#allocation6 + $0x10] sm:$0xff]   ;;  %v497_v11 = vld [vmem:[#allocation6 + $0x8] sm:$0xff]   ;;  %v498_v12 = vld [vmem:[#allocation6] sm:$0xff]  }
  0x36   :  { %435 = vmatprep.subr.bf16.mxu0 %v603_v0  ;;  %443 = vmatprep.subr.bf16.mxu1 %v603_v0  ;;  %v389_v13 = vld [vmem:[%s704_s2] ss:$0 sm:$0xff]  ;;  %v499_v21 = vld [vmem:[#allocation7 + $0x38] sm:$0xff]   ;;  %v500_v22 = vld [vmem:[#allocation7 + $0x30] sm:$0xff]  }
  0x37   :  { %v501_v23 = vld [vmem:[#allocation7 + $0x28] sm:$0xff]   ;;  %v502_v24 = vld [vmem:[#allocation7 + $0x20] sm:$0xff]   ;;  %v503_v25 = vld [vmem:[#allocation7 + $0x18] sm:$0xff]  }
  0x38   :  { %v504_v26 = vld [vmem:[#allocation7 + $0x10] sm:$0xff]   ;;  %v505_v27 = vld [vmem:[#allocation7 + $0x8] sm:$0xff]   ;;  %v506_v28 = vld [vmem:[#allocation7] sm:$0xff]  }
  0x39   :  { %436 = vmatpush3.bf16.msra.mxu0 %v490_v2  ;;  %444 = vmatpush3.bf16.msra.mxu1 %v492_v6  ;;  %v393_v29 = vld [vmem:[%s706_s4] ss:$0 sm:$0xff] }
  0x3a   :  { %461 = vmatprep.subr.bf16.mxu0 %v603_v0  ;;  %445 = vmatprep.subr.bf16.mxu1 %v603_v0  ;;  %v403_v40 = vld [vmem:[%s708_s6] ss:$0 sm:$0xff] }
  0x3c   :  { %438 = vmatmul.mubr.msk.bf16.vlgmr.msra.gmra.mxu0 %vm105_vm1, %v81_v5 }
  0x3d   :  { %477 = vmatprep.mubr.msk.bf16.mxu0 %vm604_vm0, %v603_v0  ;;  %446 = vmatpush3.bf16.msra.mxu1 %v493_v7 }
  0x3e   :  { %447 = vmatprep.subr.bf16.mxu1 %v603_v0  ;;  %462 = vmatpush3.bf16.msra.mxu0 %v499_v21 }
  0x3f   :  { %463 = vmatprep.subr.bf16.mxu0 %v603_v0 }
  0x41   :  { %448 = vmatpush3.bf16.msra.mxu1 %v494_v8 }
  0x42   :  { %449 = vmatprep.subr.bf16.mxu1 %v603_v0  ;;  %464 = vmatpush3.bf16.msra.mxu0 %v500_v22 }
  0x43   :  { %465 = vmatprep.subr.bf16.mxu0 %v603_v0 }
  0x45   :  { %450 = vmatpush3.bf16.msra.mxu1 %v495_v9 }
  0x46   :  { %451 = vmatprep.subr.bf16.mxu1 %v603_v0  ;;  %466 = vmatpush3.bf16.msra.mxu0 %v501_v23 }
  0x47   :  { %467 = vmatprep.subr.bf16.mxu0 %v603_v0 }
  0x49   :  { %452 = vmatpush3.bf16.msra.mxu1 %v496_v10 }
  0x4a   :  { %453 = vmatprep.subr.bf16.mxu1 %v603_v0  ;;  %468 = vmatpush3.bf16.msra.mxu0 %v502_v24 }
  0x4b   :  { %469 = vmatprep.subr.bf16.mxu0 %v603_v0 }
  0x4d   :  { %454 = vmatpush3.bf16.msra.mxu1 %v497_v11 }
  0x4e   :  { %455 = vmatprep.subr.bf16.mxu1 %v603_v0  ;;  %470 = vmatpush3.bf16.msra.mxu0 %v503_v25 }
  0x4f   :  { %471 = vmatprep.subr.bf16.mxu0 %v603_v0 }
  0x51   :  { %456 = vmatpush3.bf16.msra.mxu1 %v498_v12 }
  0x52   :  { %472 = vmatpush3.bf16.msra.mxu0 %v504_v26 }
  0x53   :  { %473 = vmatprep.subr.bf16.mxu0 %v603_v0 }
  0x56   :  { %474 = vmatpush3.bf16.msra.mxu0 %v505_v27 }
  0x57   :  { %475 = vmatprep.subr.bf16.mxu0 %v603_v0 }
  0x5a   :  { %476 = vmatpush3.bf16.msra.mxu0 %v506_v28 }
  0xfc   :  { %v143_v14 = vpop.f32.mrf.mxu0 }
  0xfd   :  { %v144_v15 = vadd.f32 %v389_v13, %v143_v14 }
  0xfe   :  { %v439_v16 = vpop.f32.mrf.mxu0 }
  0xff   :  { %v149_v17 = vmax.f32 %v144_v15, 0.0 }
 0x100   :  { %v146_v18 = vpop.f32.mrf.mxu0 }
 0x101   :  { %v150_v19 = vpack.c.bf16 %v149_v17, %v149_v17 }
 0x102   :  { %v440_v20 = vpop.f32.mrf.mxu0 }
 0x103   :  { %458 = vmatmul.mubr.bf16.vlgmr.msra.gmra.mxu1 %v150_v19 }
 0x1c3   :  { %v256_v30 = vpop.f32.mrf.mxu1 }
 0x1c4   :  { %v257_v31 = vadd.f32 %v393_v29, %v256_v30 }
 0x1c5   :  { %v459_v32 = vpop.f32.mrf.mxu1 }
 0x1c6   :  { %v402_v33 = vmul.f32 -1.442695, %v257_v31 }
 0x1c7   :  { %v259_v34 = vpop.f32.mrf.mxu1 }
 0x1c8   :  { %507 = vpow2.f32 %v402_v33 }
 0x1c9   :  { %v460_v35 = vpop.f32.mrf.mxu1 }
 0x1d5   :  { %v508_v36 = vpop.eup %507 }
 0x1d6   :  { %v265_v37 = vadd.f32 1.0, %v508_v36 }
 0x1d8   :  { %509 = vrcp.f32 %v265_v37 }
 0x1e5   :  { %v510_v38 = vpop.eup %509 }
 0x1e6   :  { %v268_v39 = vpack.c.bf16 %v510_v38, %v510_v38 }
 0x1e8   :  { %478 = vmatmul.mubr.bf16.vlgmr.msra.gmra.mxu0 %v268_v39 }
 0x2a8   :  { %v374_v41 = vpop.f32.mrf.mxu0 }
 0x2a9   :  { %v375_v42 = vadd.f32 %v403_v40, %v374_v41 }
 0x2aa   :  { %v479_v43 = vpop.f32.mrf.mxu0 }
 0x2ab   :  { %v380_v44 = vpack.c.bf16 %v375_v42, %v375_v42 }
 0x2ac   :  { %v377_v45 = vpop.f32.mrf.mxu0 }
 0x2ad   :  { %381 = vst [vmem:[%s709_s7] sm:$0xf] %v380_v44 }
 0x2ae   :  { %v480_v46 = vpop.f32.mrf.mxu0 }
 0x2af   :  { %386 = vsyncpa [#allocation3], 1 }
 0x2b0   :  { %387 = vsyncpa [#allocation5], 1 }
 0x2b1   :  { %388 = vsyncpa [#allocation8], 1 }

</bundles_post_ra>
